<compile_context>
chip_gen: v7x
topology: tpu7x:2x2x1
jax: 0.10.0
libtpu: 0.0.40
codegen_flags: <defaults>
</compile_context>

<pallas_src>
import functools

import jax
import jax.numpy as jnp
from jax import lax
from jax.experimental import pallas as pl
from jax.experimental.pallas import tpu as pltpu


def lstm_chunk_kernel(pg_ref, whh_ref, h0_ref, c0_ref,
                      out_ref, cn_ref, h_sc, c_sc, *, unroll):
    """One grid step == one chunk of Tc timesteps.

    pg_ref  : (Tc, B, 4H)        pre-gates (x_t @ W_ih^T, g-cols pre-scaled x2)
    whh_ref : (H, 4H)            W_hh^T (g-cols pre-scaled x2), resident
    h0/c0   : (B, H)             initial state
    out_ref : (Tc//P, B, P*H)    P packed hidden states per row (lane-dense)
    cn_ref  : (B, H)             final cell state (resident accumulator)
    h_sc/c_sc : VMEM scratch carrying the recurrent state across chunks.
    """
    chunk = pl.program_id(0)
    n_groups = out_ref.shape[0]            # Tc // P
    H = h_sc.shape[-1]
    P = out_ref.shape[-1] // H             # timesteps packed per 128-lane store

    @pl.when(chunk == 0)
    def _():
        h_sc[...] = h0_ref[...]
        c_sc[...] = c0_ref[...]

    whh = whh_ref[...]                     # hoist: read once per chunk

    def group(tp, carry):
        h, c = carry
        base = pl.multiple_of(tp * P, P)
        pg_blk = pg_ref[pl.ds(base, P)]    # (P, B, 4H) — one load per group
        hs = []
        for p in range(P):                 # static inner unroll over the pack
            # gates: (B, 4H) — pre-gate + single small recurrent matmul.
            gates = pg_blk[p] + jnp.dot(h, whh,
                                        preferred_element_type=jnp.float32)
            # Single EUP push over the full lane-dense (B, 128) slab.
            sig = jax.nn.sigmoid(gates)
            i_g = sig[:, 0 * H:1 * H]
            f_g = sig[:, 1 * H:2 * H]
            # tanh(x) = 2*sigmoid(2x) - 1 (g columns were pre-scaled by 2).
            g_g = 2.0 * sig[:, 2 * H:3 * H] - 1.0
            o_g = sig[:, 3 * H:4 * H]
            c = f_g * c + i_g * g_g
            h = o_g * jnp.tanh(c)
            hs.append(h)
        # One unmasked, 128-lane-wide store per P timesteps.
        out_ref[tp] = jnp.concatenate(hs, axis=-1).astype(out_ref.dtype)
        return h, c

    h, c = lax.fori_loop(0, n_groups, group, (h_sc[...], c_sc[...]),
                         unroll=unroll)

    h_sc[...] = h
    c_sc[...] = c

    @pl.when(chunk == pl.num_programs(0) - 1)
    def _():
        cn_ref[...] = c.astype(cn_ref.dtype)


def _pick_pack(T, H, lane=128):
    """Timesteps packed per output row: largest p <= 128//H that divides T."""
    pmax = max(1, lane // H)
    for p in range(pmax, 0, -1):
        if T % p == 0:
            return p
    return 1


def _pick_chunk(T, P, bytes_per_step, budget=4 << 20):
    """Largest multiple of P that divides T and fits the streaming budget."""
    max_chunk = max(P, budget // max(1, bytes_per_step))
    best = P
    for tc in range(P, T + 1, P):
        if T % tc == 0 and tc <= max_chunk:
            best = tc
    return best


@jax.jit
def encoder_rnn_forward(token_ids, h0, c0, emb_table, w_ih, w_hh):
    """Forward pass of EncoderRNN (lens=None path).

    token_ids : (B, T) int32
    h0, c0    : (1, B, H) float32
    emb_table : (V, E) float32
    w_ih      : (4H, E) float32   (PyTorch weight_ih_l0)
    w_hh      : (4H, H) float32   (PyTorch weight_hh_l0)

    Returns (output (B, T, H), hn (1, B, H), cn (1, B, H)).
    """
    B, T = token_ids.shape
    H = w_hh.shape[1]

    P = _pick_pack(T, H)                                 # timesteps per packed row
    # Streaming bytes per timestep: double-buffered pre-gates + packed output.
    bytes_per_step = 2 * B * 4 * H * 4 + 2 * B * H * 4
    Tc = _pick_chunk(T, P, bytes_per_step)
    n_groups = Tc // P
    unroll = True if n_groups <= 8 else 4

    # --- glue in plain XLA (one big MXU-friendly matmul + gather) ---------
    # emb(x) @ W_ih^T  ==  (emb_table @ W_ih^T)[token]   (bias=False)
    # g-gate columns pre-scaled by 2 for the tanh = 2*sigmoid(2x)-1 identity.
    gate_scale = jnp.ones((4 * H,), jnp.float32).at[2 * H:3 * H].set(2.0)
    proj_table = jnp.dot(emb_table, w_ih.T,
                         preferred_element_type=jnp.float32) * gate_scale  # (V, 4H)
    pg_tb = jnp.take(proj_table, token_ids.T, axis=0)    # (T, B, 4H) time-major
    whh_t = jnp.transpose(w_hh) * gate_scale             # (H, 4H)
    h0_2d = h0[0]                                        # (B, H)
    c0_2d = c0[0]                                        # (B, H)

    kernel = functools.partial(lstm_chunk_kernel, unroll=unroll)

    out_pk, cn = pl.pallas_call(
        kernel,
        out_shape=(
            jax.ShapeDtypeStruct((T // P, B, P * H), jnp.float32),
            jax.ShapeDtypeStruct((B, H), jnp.float32),
        ),
        grid_spec=pltpu.PrefetchScalarGridSpec(
            num_scalar_prefetch=0,
            grid=(T // Tc,),
            in_specs=[
                pl.BlockSpec((Tc, B, 4 * H), lambda c: (c, 0, 0)),   # pre-gates chunk
                pl.BlockSpec((H, 4 * H), lambda c: (0, 0)),          # W_hh^T (resident)
                pl.BlockSpec((B, H), lambda c: (0, 0)),              # h0
                pl.BlockSpec((B, H), lambda c: (0, 0)),              # c0
            ],
            out_specs=[
                pl.BlockSpec((Tc // P, B, P * H), lambda c: (c, 0, 0)),  # packed output
                pl.BlockSpec((B, H), lambda c: (0, 0)),                  # cn (resident)
            ],
            scratch_shapes=[
                pltpu.VMEM((B, H), jnp.float32),                     # h state carry
                pltpu.VMEM((B, H), jnp.float32),                     # c state carry
            ],
        ),
        compiler_params=pltpu.CompilerParams(
            dimension_semantics=("arbitrary",)),                     # recurrence: sequential
    )(pg_tb, whh_t, h0_2d, c0_2d)

    # Unpack (T/P, B, P*H) -> (B, T, H) batch_first.
    output = jnp.transpose(out_pk.reshape(T // P, B, P, H),
                           (1, 0, 2, 3)).reshape(B, T, H)
    hn = output[:, -1, :]                                            # (B, H) last h
    return output, hn[None], cn[None]


def _reference_forward(token_ids, h0, c0, emb_table, w_ih, w_hh):
    """Pure-JAX reference LSTM (PyTorch semantics, bias=False, batch_first)."""
    emb = jnp.take(emb_table, token_ids, axis=0)        # (B, T, E)
    x_tbe = jnp.transpose(emb, (1, 0, 2))               # (T, B, E)
    H = w_hh.shape[1]

    def step(carry, x_t):
        h, c = carry
        gates = x_t @ w_ih.T + h @ w_hh.T
        i = jax.nn.sigmoid(gates[:, 0 * H:1 * H])
        f = jax.nn.sigmoid(gates[:, 1 * H:2 * H])
        g = jnp.tanh(gates[:, 2 * H:3 * H])
        o = jax.nn.sigmoid(gates[:, 3 * H:4 * H])
        c_new = f * c + i * g
        h_new = o * jnp.tanh(c_new)
        return (h_new, c_new), h_new

    (hn, cn), out_tbh = lax.scan(step, (h0[0], c0[0]), x_tbe)
    return jnp.transpose(out_tbh, (1, 0, 2)), hn[None], cn[None]


if __name__ == "__main__":
    # Small deterministic setup consistent with the module's __init__.
    VOCAB = 50      # len(vocab)
    E = 32          # embed_dim
    H = 32          # hidden_dim
    B = 8           # batch
    T = 8           # sequence length

    key = jax.random.PRNGKey(0)
    k_emb, k_ih, k_hh, k_h0, k_c0, k_ids = jax.random.split(key, 6)

    emb_table = jax.random.normal(k_emb, (VOCAB, E), dtype=jnp.float32) * 0.1
    w_ih = jax.random.normal(k_ih, (4 * H, E), dtype=jnp.float32) * 0.1
    w_hh = jax.random.normal(k_hh, (4 * H, H), dtype=jnp.float32) * 0.1
    h0 = jax.random.normal(k_h0, (1, B, H), dtype=jnp.float32) * 0.1
    c0 = jax.random.normal(k_c0, (1, B, H), dtype=jnp.float32) * 0.1
    token_ids = jax.random.randint(k_ids, (B, T), 0, VOCAB, dtype=jnp.int32)

    output, hn, cn = encoder_rnn_forward(token_ids, h0, c0, emb_table, w_ih, w_hh)
    jax.block_until_ready((output, hn, cn))

    assert output.shape == (B, T, H)
    assert hn.shape == (1, B, H)
    assert cn.shape == (1, B, H)

    # Loose-tolerance check against a pure-JAX reference (f32 vs f64 PyTorch,
    # tanh computed via the sigmoid identity in the kernel).
    ref_out, ref_hn, ref_cn = _reference_forward(
        token_ids, h0, c0, emb_table, w_ih, w_hh)
    assert jnp.allclose(output, ref_out, atol=1e-2, rtol=1e-2)
    assert jnp.allclose(hn, ref_hn, atol=1e-2, rtol=1e-2)
    assert jnp.allclose(cn, ref_cn, atol=1e-2, rtol=1e-2)

    print("KERNEL_OK")
</pallas_src>

<mosaic_0001>
module attributes {stable_mosaic.version = 11 : i64} {
  func.func @lstm_chunk_kernel(%arg0: i32, %arg1: memref<8x8x128xf32, #tpu.memory_space<vmem>>, %arg2: memref<32x128xf32, #tpu.memory_space<vmem>>, %arg3: memref<8x32xf32, #tpu.memory_space<vmem>>, %arg4: memref<8x32xf32, #tpu.memory_space<vmem>>, %arg5: memref<2x8x128xf32, #tpu.memory_space<vmem>>, %arg6: memref<8x32xf32, #tpu.memory_space<vmem>>, %arg7: memref<8x32xf32, #tpu.memory_space<vmem>>, %arg8: memref<8x32xf32, #tpu.memory_space<vmem>>) attributes {dimension_semantics = [#tpu.dimension_semantics<arbitrary>], iteration_bounds = array<i64: 1>, scalar_prefetch = 0 : i64, scratch_operands = 2 : i64, tpu.core_type = #tpu.core_type<tc>, window_params = [{transform_indices = @transform_0, window_bounds = array<i64: 8, 8, 128>}, {pipeline_mode = #tpu.pipeline_mode<synchronous>, transform_indices = @transform_1, window_bounds = array<i64: 32, 128>}, {pipeline_mode = #tpu.pipeline_mode<synchronous>, transform_indices = @transform_2, window_bounds = array<i64: 8, 32>}, {pipeline_mode = #tpu.pipeline_mode<synchronous>, transform_indices = @transform_3, window_bounds = array<i64: 8, 32>}, {transform_indices = @transform_4, window_bounds = array<i64: 2, 8, 128>}, {pipeline_mode = #tpu.pipeline_mode<synchronous>, transform_indices = @transform_5, window_bounds = array<i64: 8, 32>}]} {
    %c0_i32 = arith.constant 0 : i32
    %0 = arith.cmpi eq, %arg0, %c0_i32 : i32
    %1 = arith.extui %0 : i1 to i32
    %c0_i32_0 = arith.constant 0 : i32
    %2 = arith.cmpi ne, %1, %c0_i32_0 : i32
    scf.if %2 {
      %c0_53 = arith.constant 0 : index
      %c0_54 = arith.constant 0 : index
      %205 = vector.load %arg3[%c0_53, %c0_54] : memref<8x32xf32, #tpu.memory_space<vmem>>, vector<8x32xf32>
      %c0_55 = arith.constant 0 : index
      %c0_56 = arith.constant 0 : index
      %206 = vector.load %arg7[%c0_55, %c0_56] : memref<8x32xf32, #tpu.memory_space<vmem>>, vector<8x32xf32>
      tpu.vector_store %arg7[%c0_55, %c0_56], %205 {strides = array<i32>} : memref<8x32xf32, #tpu.memory_space<vmem>>, vector<8x32xf32>,
      %c0_57 = arith.constant 0 : index
      %c0_58 = arith.constant 0 : index
      %207 = vector.load %arg4[%c0_57, %c0_58] : memref<8x32xf32, #tpu.memory_space<vmem>>, vector<8x32xf32>
      %c0_59 = arith.constant 0 : index
      %c0_60 = arith.constant 0 : index
      %208 = vector.load %arg8[%c0_59, %c0_60] : memref<8x32xf32, #tpu.memory_space<vmem>>, vector<8x32xf32>
      tpu.vector_store %arg8[%c0_59, %c0_60], %207 {strides = array<i32>} : memref<8x32xf32, #tpu.memory_space<vmem>>, vector<8x32xf32>,
    } else {
    }
    %c0 = arith.constant 0 : index
    %c0_1 = arith.constant 0 : index
    %3 = vector.load %arg2[%c0, %c0_1] : memref<32x128xf32, #tpu.memory_space<vmem>>, vector<32x128xf32>
    %c0_2 = arith.constant 0 : index
    %c0_3 = arith.constant 0 : index
    %4 = vector.load %arg7[%c0_2, %c0_3] : memref<8x32xf32, #tpu.memory_space<vmem>>, vector<8x32xf32>
    %c0_4 = arith.constant 0 : index
    %c0_5 = arith.constant 0 : index
    %5 = vector.load %arg8[%c0_4, %c0_5] : memref<8x32xf32, #tpu.memory_space<vmem>>, vector<8x32xf32>
    %c0_i32_6 = arith.constant 0 : i32
    %c4_i32 = arith.constant 4 : i32
    %6 = arith.muli %c0_i32_6, %c4_i32 : i32
    %7 = tpu.assume_multiple %6, 4 : i32
    %8 = arith.index_cast %7 : i32 to index
    %c0_7 = arith.constant 0 : index
    %c0_8 = arith.constant 0 : index
    %9 = vector.load %arg1[%8, %c0_7, %c0_8] : memref<8x8x128xf32, #tpu.memory_space<vmem>>, vector<4x8x128xf32>
    %10 = vector.extract_strided_slice %9 {offsets = [0, 0, 0], sizes = [1, 8, 128], strides = [1, 1, 1]} : vector<4x8x128xf32> to vector<1x8x128xf32>
    %11 = vector.shape_cast %10 : vector<1x8x128xf32> to vector<8x128xf32>
    %cst = arith.constant dense<0.000000e+00> : vector<8x128xf32>
    %12 = tpu.matmul %4, %3, %cst {dimension_numbers = #tpu.dot_dimension_numbers<[1], [0], [0], [1], [0, 0, 1, 1], [], []>} : vector<8x32xf32>, vector<32x128xf32>, vector<8x128xf32> -> vector<8x128xf32>
    %13 = arith.addf %11, %12 : vector<8x128xf32>
    %14 = arith.negf %13 : vector<8x128xf32>
    %15 = math.exp %14 : vector<8x128xf32>
    %cst_9 = arith.constant 1.000000e+00 : f32
    %16 = vector.broadcast %cst_9 : f32 to vector<8x128xf32>
    %17 = arith.addf %16, %15 : vector<8x128xf32>
    %18 = arith.divf %16, %17 : vector<8x128xf32>
    %19 = vector.extract_strided_slice %18 {offsets = [0, 0], sizes = [8, 32], strides = [1, 1]} : vector<8x128xf32> to vector<8x32xf32>
    %20 = vector.extract_strided_slice %18 {offsets = [0, 32], sizes = [8, 32], strides = [1, 1]} : vector<8x128xf32> to vector<8x32xf32>
    %21 = vector.extract_strided_slice %18 {offsets = [0, 64], sizes = [8, 32], strides = [1, 1]} : vector<8x128xf32> to vector<8x32xf32>
    %cst_10 = arith.constant 2.000000e+00 : f32
    %22 = vector.broadcast %cst_10 : f32 to vector<8x32xf32>
    %23 = arith.mulf %22, %21 : vector<8x32xf32>
    %cst_11 = arith.constant 1.000000e+00 : f32
    %24 = vector.broadcast %cst_11 : f32 to vector<8x32xf32>
    %25 = arith.subf %23, %24 : vector<8x32xf32>
    %26 = vector.extract_strided_slice %18 {offsets = [0, 96], sizes = [8, 32], strides = [1, 1]} : vector<8x128xf32> to vector<8x32xf32>
    %27 = arith.mulf %20, %5 : vector<8x32xf32>
    %28 = arith.mulf %19, %25 : vector<8x32xf32>
    %29 = arith.addf %27, %28 : vector<8x32xf32>
    %30 = math.tanh %29 : vector<8x32xf32>
    %31 = arith.mulf %26, %30 : vector<8x32xf32>
    %32 = vector.extract_strided_slice %9 {offsets = [1, 0, 0], sizes = [1, 8, 128], strides = [1, 1, 1]} : vector<4x8x128xf32> to vector<1x8x128xf32>
    %33 = vector.shape_cast %32 : vector<1x8x128xf32> to vector<8x128xf32>
    %cst_12 = arith.constant dense<0.000000e+00> : vector<8x128xf32>
    %34 = tpu.matmul %31, %3, %cst_12 {dimension_numbers = #tpu.dot_dimension_numbers<[1], [0], [0], [1], [0, 0, 1, 1], [], []>} : vector<8x32xf32>, vector<32x128xf32>, vector<8x128xf32> -> vector<8x128xf32>
    %35 = arith.addf %33, %34 : vector<8x128xf32>
    %36 = arith.negf %35 : vector<8x128xf32>
    %37 = math.exp %36 : vector<8x128xf32>
    %cst_13 = arith.constant 1.000000e+00 : f32
    %38 = vector.broadcast %cst_13 : f32 to vector<8x128xf32>
    %39 = arith.addf %38, %37 : vector<8x128xf32>
    %40 = arith.divf %38, %39 : vector<8x128xf32>
    %41 = vector.extract_strided_slice %40 {offsets = [0, 0], sizes = [8, 32], strides = [1, 1]} : vector<8x128xf32> to vector<8x32xf32>
    %42 = vector.extract_strided_slice %40 {offsets = [0, 32], sizes = [8, 32], strides = [1, 1]} : vector<8x128xf32> to vector<8x32xf32>
    %43 = vector.extract_strided_slice %40 {offsets = [0, 64], sizes = [8, 32], strides = [1, 1]} : vector<8x128xf32> to vector<8x32xf32>
    %cst_14 = arith.constant 2.000000e+00 : f32
    %44 = vector.broadcast %cst_14 : f32 to vector<8x32xf32>
    %45 = arith.mulf %44, %43 : vector<8x32xf32>
    %cst_15 = arith.constant 1.000000e+00 : f32
    %46 = vector.broadcast %cst_15 : f32 to vector<8x32xf32>
    %47 = arith.subf %45, %46 : vector<8x32xf32>
    %48 = vector.extract_strided_slice %40 {offsets = [0, 96], sizes = [8, 32], strides = [1, 1]} : vector<8x128xf32> to vector<8x32xf32>
    %49 = arith.mulf %42, %29 : vector<8x32xf32>
    %50 = arith.mulf %41, %47 : vector<8x32xf32>
    %51 = arith.addf %49, %50 : vector<8x32xf32>
    %52 = math.tanh %51 : vector<8x32xf32>
    %53 = arith.mulf %48, %52 : vector<8x32xf32>
    %54 = vector.extract_strided_slice %9 {offsets = [2, 0, 0], sizes = [1, 8, 128], strides = [1, 1, 1]} : vector<4x8x128xf32> to vector<1x8x128xf32>
    %55 = vector.shape_cast %54 : vector<1x8x128xf32> to vector<8x128xf32>
    %cst_16 = arith.constant dense<0.000000e+00> : vector<8x128xf32>
    %56 = tpu.matmul %53, %3, %cst_16 {dimension_numbers = #tpu.dot_dimension_numbers<[1], [0], [0], [1], [0, 0, 1, 1], [], []>} : vector<8x32xf32>, vector<32x128xf32>, vector<8x128xf32> -> vector<8x128xf32>
    %57 = arith.addf %55, %56 : vector<8x128xf32>
    %58 = arith.negf %57 : vector<8x128xf32>
    %59 = math.exp %58 : vector<8x128xf32>
    %cst_17 = arith.constant 1.000000e+00 : f32
    %60 = vector.broadcast %cst_17 : f32 to vector<8x128xf32>
    %61 = arith.addf %60, %59 : vector<8x128xf32>
    %62 = arith.divf %60, %61 : vector<8x128xf32>
    %63 = vector.extract_strided_slice %62 {offsets = [0, 0], sizes = [8, 32], strides = [1, 1]} : vector<8x128xf32> to vector<8x32xf32>
    %64 = vector.extract_strided_slice %62 {offsets = [0, 32], sizes = [8, 32], strides = [1, 1]} : vector<8x128xf32> to vector<8x32xf32>
    %65 = vector.extract_strided_slice %62 {offsets = [0, 64], sizes = [8, 32], strides = [1, 1]} : vector<8x128xf32> to vector<8x32xf32>
    %cst_18 = arith.constant 2.000000e+00 : f32
    %66 = vector.broadcast %cst_18 : f32 to vector<8x32xf32>
    %67 = arith.mulf %66, %65 : vector<8x32xf32>
    %cst_19 = arith.constant 1.000000e+00 : f32
    %68 = vector.broadcast %cst_19 : f32 to vector<8x32xf32>
    %69 = arith.subf %67, %68 : vector<8x32xf32>
    %70 = vector.extract_strided_slice %62 {offsets = [0, 96], sizes = [8, 32], strides = [1, 1]} : vector<8x128xf32> to vector<8x32xf32>
    %71 = arith.mulf %64, %51 : vector<8x32xf32>
    %72 = arith.mulf %63, %69 : vector<8x32xf32>
    %73 = arith.addf %71, %72 : vector<8x32xf32>
    %74 = math.tanh %73 : vector<8x32xf32>
    %75 = arith.mulf %70, %74 : vector<8x32xf32>
    %76 = vector.extract_strided_slice %9 {offsets = [3, 0, 0], sizes = [1, 8, 128], strides = [1, 1, 1]} : vector<4x8x128xf32> to vector<1x8x128xf32>
    %77 = vector.shape_cast %76 : vector<1x8x128xf32> to vector<8x128xf32>
    %cst_20 = arith.constant dense<0.000000e+00> : vector<8x128xf32>
    %78 = tpu.matmul %75, %3, %cst_20 {dimension_numbers = #tpu.dot_dimension_numbers<[1], [0], [0], [1], [0, 0, 1, 1], [], []>} : vector<8x32xf32>, vector<32x128xf32>, vector<8x128xf32> -> vector<8x128xf32>
    %79 = arith.addf %77, %78 : vector<8x128xf32>
    %80 = arith.negf %79 : vector<8x128xf32>
    %81 = math.exp %80 : vector<8x128xf32>
    %cst_21 = arith.constant 1.000000e+00 : f32
    %82 = vector.broadcast %cst_21 : f32 to vector<8x128xf32>
    %83 = arith.addf %82, %81 : vector<8x128xf32>
    %84 = arith.divf %82, %83 : vector<8x128xf32>
    %85 = vector.extract_strided_slice %84 {offsets = [0, 0], sizes = [8, 32], strides = [1, 1]} : vector<8x128xf32> to vector<8x32xf32>
    %86 = vector.extract_strided_slice %84 {offsets = [0, 32], sizes = [8, 32], strides = [1, 1]} : vector<8x128xf32> to vector<8x32xf32>
    %87 = vector.extract_strided_slice %84 {offsets = [0, 64], sizes = [8, 32], strides = [1, 1]} : vector<8x128xf32> to vector<8x32xf32>
    %cst_22 = arith.constant 2.000000e+00 : f32
    %88 = vector.broadcast %cst_22 : f32 to vector<8x32xf32>
    %89 = arith.mulf %88, %87 : vector<8x32xf32>
    %cst_23 = arith.constant 1.000000e+00 : f32
    %90 = vector.broadcast %cst_23 : f32 to vector<8x32xf32>
    %91 = arith.subf %89, %90 : vector<8x32xf32>
    %92 = vector.extract_strided_slice %84 {offsets = [0, 96], sizes = [8, 32], strides = [1, 1]} : vector<8x128xf32> to vector<8x32xf32>
    %93 = arith.mulf %86, %73 : vector<8x32xf32>
    %94 = arith.mulf %85, %91 : vector<8x32xf32>
    %95 = arith.addf %93, %94 : vector<8x32xf32>
    %96 = math.tanh %95 : vector<8x32xf32>
    %97 = arith.mulf %92, %96 : vector<8x32xf32>
    %98 = tpu.concatenate %31, %53, %75, %97 in 1 : vector<8x32xf32>, vector<8x32xf32>, vector<8x32xf32>, vector<8x32xf32> -> vector<8x128xf32>
    %99 = arith.index_cast %c0_i32_6 : i32 to index
    %c0_24 = arith.constant 0 : index
    %c0_25 = arith.constant 0 : index
    %100 = vector.load %arg5[%99, %c0_24, %c0_25] : memref<2x8x128xf32, #tpu.memory_space<vmem>>, vector<1x8x128xf32>
    %101 = vector.shape_cast %100 : vector<1x8x128xf32> to vector<8x128xf32>
    %102 = vector.shape_cast %98 : vector<8x128xf32> to vector<1x8x128xf32>
    tpu.vector_store %arg5[%99, %c0_24, %c0_25], %102 {strides = array<i32>} : memref<2x8x128xf32, #tpu.memory_space<vmem>>, vector<1x8x128xf32>,
    %c1_i32 = arith.constant 1 : i32
    %c4_i32_26 = arith.constant 4 : i32
    %103 = arith.muli %c1_i32, %c4_i32_26 : i32
    %104 = tpu.assume_multiple %103, 4 : i32
    %105 = arith.index_cast %104 : i32 to index
    %c0_27 = arith.constant 0 : index
    %c0_28 = arith.constant 0 : index
    %106 = vector.load %arg1[%105, %c0_27, %c0_28] : memref<8x8x128xf32, #tpu.memory_space<vmem>>, vector<4x8x128xf32>
    %107 = vector.extract_strided_slice %106 {offsets = [0, 0, 0], sizes = [1, 8, 128], strides = [1, 1, 1]} : vector<4x8x128xf32> to vector<1x8x128xf32>
    %108 = vector.shape_cast %107 : vector<1x8x128xf32> to vector<8x128xf32>
    %cst_29 = arith.constant dense<0.000000e+00> : vector<8x128xf32>
    %109 = tpu.matmul %97, %3, %cst_29 {dimension_numbers = #tpu.dot_dimension_numbers<[1], [0], [0], [1], [0, 0, 1, 1], [], []>} : vector<8x32xf32>, vector<32x128xf32>, vector<8x128xf32> -> vector<8x128xf32>
    %110 = arith.addf %108, %109 : vector<8x128xf32>
    %111 = arith.negf %110 : vector<8x128xf32>
    %112 = math.exp %111 : vector<8x128xf32>
    %cst_30 = arith.constant 1.000000e+00 : f32
    %113 = vector.broadcast %cst_30 : f32 to vector<8x128xf32>
    %114 = arith.addf %113, %112 : vector<8x128xf32>
    %115 = arith.divf %113, %114 : vector<8x128xf32>
    %116 = vector.extract_strided_slice %115 {offsets = [0, 0], sizes = [8, 32], strides = [1, 1]} : vector<8x128xf32> to vector<8x32xf32>
    %117 = vector.extract_strided_slice %115 {offsets = [0, 32], sizes = [8, 32], strides = [1, 1]} : vector<8x128xf32> to vector<8x32xf32>
    %118 = vector.extract_strided_slice %115 {offsets = [0, 64], sizes = [8, 32], strides = [1, 1]} : vector<8x128xf32> to vector<8x32xf32>
    %cst_31 = arith.constant 2.000000e+00 : f32
    %119 = vector.broadcast %cst_31 : f32 to vector<8x32xf32>
    %120 = arith.mulf %119, %118 : vector<8x32xf32>
    %cst_32 = arith.constant 1.000000e+00 : f32
    %121 = vector.broadcast %cst_32 : f32 to vector<8x32xf32>
    %122 = arith.subf %120, %121 : vector<8x32xf32>
    %123 = vector.extract_strided_slice %115 {offsets = [0, 96], sizes = [8, 32], strides = [1, 1]} : vector<8x128xf32> to vector<8x32xf32>
    %124 = arith.mulf %117, %95 : vector<8x32xf32>
    %125 = arith.mulf %116, %122 : vector<8x32xf32>
    %126 = arith.addf %124, %125 : vector<8x32xf32>
    %127 = math.tanh %126 : vector<8x32xf32>
    %128 = arith.mulf %123, %127 : vector<8x32xf32>
    %129 = vector.extract_strided_slice %106 {offsets = [1, 0, 0], sizes = [1, 8, 128], strides = [1, 1, 1]} : vector<4x8x128xf32> to vector<1x8x128xf32>
    %130 = vector.shape_cast %129 : vector<1x8x128xf32> to vector<8x128xf32>
    %cst_33 = arith.constant dense<0.000000e+00> : vector<8x128xf32>
    %131 = tpu.matmul %128, %3, %cst_33 {dimension_numbers = #tpu.dot_dimension_numbers<[1], [0], [0], [1], [0, 0, 1, 1], [], []>} : vector<8x32xf32>, vector<32x128xf32>, vector<8x128xf32> -> vector<8x128xf32>
    %132 = arith.addf %130, %131 : vector<8x128xf32>
    %133 = arith.negf %132 : vector<8x128xf32>
    %134 = math.exp %133 : vector<8x128xf32>
    %cst_34 = arith.constant 1.000000e+00 : f32
    %135 = vector.broadcast %cst_34 : f32 to vector<8x128xf32>
    %136 = arith.addf %135, %134 : vector<8x128xf32>
    %137 = arith.divf %135, %136 : vector<8x128xf32>
    %138 = vector.extract_strided_slice %137 {offsets = [0, 0], sizes = [8, 32], strides = [1, 1]} : vector<8x128xf32> to vector<8x32xf32>
    %139 = vector.extract_strided_slice %137 {offsets = [0, 32], sizes = [8, 32], strides = [1, 1]} : vector<8x128xf32> to vector<8x32xf32>
    %140 = vector.extract_strided_slice %137 {offsets = [0, 64], sizes = [8, 32], strides = [1, 1]} : vector<8x128xf32> to vector<8x32xf32>
    %cst_35 = arith.constant 2.000000e+00 : f32
    %141 = vector.broadcast %cst_35 : f32 to vector<8x32xf32>
    %142 = arith.mulf %141, %140 : vector<8x32xf32>
    %cst_36 = arith.constant 1.000000e+00 : f32
    %143 = vector.broadcast %cst_36 : f32 to vector<8x32xf32>
    %144 = arith.subf %142, %143 : vector<8x32xf32>
    %145 = vector.extract_strided_slice %137 {offsets = [0, 96], sizes = [8, 32], strides = [1, 1]} : vector<8x128xf32> to vector<8x32xf32>
    %146 = arith.mulf %139, %126 : vector<8x32xf32>
    %147 = arith.mulf %138, %144 : vector<8x32xf32>
    %148 = arith.addf %146, %147 : vector<8x32xf32>
    %149 = math.tanh %148 : vector<8x32xf32>
    %150 = arith.mulf %145, %149 : vector<8x32xf32>
    %151 = vector.extract_strided_slice %106 {offsets = [2, 0, 0], sizes = [1, 8, 128], strides = [1, 1, 1]} : vector<4x8x128xf32> to vector<1x8x128xf32>
    %152 = vector.shape_cast %151 : vector<1x8x128xf32> to vector<8x128xf32>
    %cst_37 = arith.constant dense<0.000000e+00> : vector<8x128xf32>
    %153 = tpu.matmul %150, %3, %cst_37 {dimension_numbers = #tpu.dot_dimension_numbers<[1], [0], [0], [1], [0, 0, 1, 1], [], []>} : vector<8x32xf32>, vector<32x128xf32>, vector<8x128xf32> -> vector<8x128xf32>
    %154 = arith.addf %152, %153 : vector<8x128xf32>
    %155 = arith.negf %154 : vector<8x128xf32>
    %156 = math.exp %155 : vector<8x128xf32>
    %cst_38 = arith.constant 1.000000e+00 : f32
    %157 = vector.broadcast %cst_38 : f32 to vector<8x128xf32>
    %158 = arith.addf %157, %156 : vector<8x128xf32>
    %159 = arith.divf %157, %158 : vector<8x128xf32>
    %160 = vector.extract_strided_slice %159 {offsets = [0, 0], sizes = [8, 32], strides = [1, 1]} : vector<8x128xf32> to vector<8x32xf32>
    %161 = vector.extract_strided_slice %159 {offsets = [0, 32], sizes = [8, 32], strides = [1, 1]} : vector<8x128xf32> to vector<8x32xf32>
    %162 = vector.extract_strided_slice %159 {offsets = [0, 64], sizes = [8, 32], strides = [1, 1]} : vector<8x128xf32> to vector<8x32xf32>
    %cst_39 = arith.constant 2.000000e+00 : f32
    %163 = vector.broadcast %cst_39 : f32 to vector<8x32xf32>
    %164 = arith.mulf %163, %162 : vector<8x32xf32>
    %cst_40 = arith.constant 1.000000e+00 : f32
    %165 = vector.broadcast %cst_40 : f32 to vector<8x32xf32>
    %166 = arith.subf %164, %165 : vector<8x32xf32>
    %167 = vector.extract_strided_slice %159 {offsets = [0, 96], sizes = [8, 32], strides = [1, 1]} : vector<8x128xf32> to vector<8x32xf32>
    %168 = arith.mulf %161, %148 : vector<8x32xf32>
    %169 = arith.mulf %160, %166 : vector<8x32xf32>
    %170 = arith.addf %168, %169 : vector<8x32xf32>
    %171 = math.tanh %170 : vector<8x32xf32>
    %172 = arith.mulf %167, %171 : vector<8x32xf32>
    %173 = vector.extract_strided_slice %106 {offsets = [3, 0, 0], sizes = [1, 8, 128], strides = [1, 1, 1]} : vector<4x8x128xf32> to vector<1x8x128xf32>
    %174 = vector.shape_cast %173 : vector<1x8x128xf32> to vector<8x128xf32>
    %cst_41 = arith.constant dense<0.000000e+00> : vector<8x128xf32>
    %175 = tpu.matmul %172, %3, %cst_41 {dimension_numbers = #tpu.dot_dimension_numbers<[1], [0], [0], [1], [0, 0, 1, 1], [], []>} : vector<8x32xf32>, vector<32x128xf32>, vector<8x128xf32> -> vector<8x128xf32>
    %176 = arith.addf %174, %175 : vector<8x128xf32>
    %177 = arith.negf %176 : vector<8x128xf32>
    %178 = math.exp %177 : vector<8x128xf32>
    %cst_42 = arith.constant 1.000000e+00 : f32
    %179 = vector.broadcast %cst_42 : f32 to vector<8x128xf32>
    %180 = arith.addf %179, %178 : vector<8x128xf32>
    %181 = arith.divf %179, %180 : vector<8x128xf32>
    %182 = vector.extract_strided_slice %181 {offsets = [0, 0], sizes = [8, 32], strides = [1, 1]} : vector<8x128xf32> to vector<8x32xf32>
    %183 = vector.extract_strided_slice %181 {offsets = [0, 32], sizes = [8, 32], strides = [1, 1]} : vector<8x128xf32> to vector<8x32xf32>
    %184 = vector.extract_strided_slice %181 {offsets = [0, 64], sizes = [8, 32], strides = [1, 1]} : vector<8x128xf32> to vector<8x32xf32>
    %cst_43 = arith.constant 2.000000e+00 : f32
    %185 = vector.broadcast %cst_43 : f32 to vector<8x32xf32>
    %186 = arith.mulf %185, %184 : vector<8x32xf32>
    %cst_44 = arith.constant 1.000000e+00 : f32
    %187 = vector.broadcast %cst_44 : f32 to vector<8x32xf32>
    %188 = arith.subf %186, %187 : vector<8x32xf32>
    %189 = vector.extract_strided_slice %181 {offsets = [0, 96], sizes = [8, 32], strides = [1, 1]} : vector<8x128xf32> to vector<8x32xf32>
    %190 = arith.mulf %183, %170 : vector<8x32xf32>
    %191 = arith.mulf %182, %188 : vector<8x32xf32>
    %192 = arith.addf %190, %191 : vector<8x32xf32>
    %193 = math.tanh %192 : vector<8x32xf32>
    %194 = arith.mulf %189, %193 : vector<8x32xf32>
    %195 = tpu.concatenate %128, %150, %172, %194 in 1 : vector<8x32xf32>, vector<8x32xf32>, vector<8x32xf32>, vector<8x32xf32> -> vector<8x128xf32>
    %196 = arith.index_cast %c1_i32 : i32 to index
    %c0_45 = arith.constant 0 : index
    %c0_46 = arith.constant 0 : index
    %197 = vector.load %arg5[%196, %c0_45, %c0_46] : memref<2x8x128xf32, #tpu.memory_space<vmem>>, vector<1x8x128xf32>
    %198 = vector.shape_cast %197 : vector<1x8x128xf32> to vector<8x128xf32>
    %199 = vector.shape_cast %195 : vector<8x128xf32> to vector<1x8x128xf32>
    tpu.vector_store %arg5[%196, %c0_45, %c0_46], %199 {strides = array<i32>} : memref<2x8x128xf32, #tpu.memory_space<vmem>>, vector<1x8x128xf32>,
    %c2_i32 = arith.constant 2 : i32
    %c0_47 = arith.constant 0 : index
    %c0_48 = arith.constant 0 : index
    %200 = vector.load %arg7[%c0_47, %c0_48] : memref<8x32xf32, #tpu.memory_space<vmem>>, vector<8x32xf32>
    tpu.vector_store %arg7[%c0_47, %c0_48], %194 {strides = array<i32>} : memref<8x32xf32, #tpu.memory_space<vmem>>, vector<8x32xf32>,
    %c0_49 = arith.constant 0 : index
    %c0_50 = arith.constant 0 : index
    %201 = vector.load %arg8[%c0_49, %c0_50] : memref<8x32xf32, #tpu.memory_space<vmem>>, vector<8x32xf32>
    tpu.vector_store %arg8[%c0_49, %c0_50], %192 {strides = array<i32>} : memref<8x32xf32, #tpu.memory_space<vmem>>, vector<8x32xf32>,
    %c0_i32_51 = arith.constant 0 : i32
    %202 = arith.cmpi eq, %arg0, %c0_i32_51 : i32
    %203 = arith.extui %202 : i1 to i32
    %c0_i32_52 = arith.constant 0 : i32
    %204 = arith.cmpi ne, %203, %c0_i32_52 : i32
    scf.if %204 {
      %c0_53 = arith.constant 0 : index
      %c0_54 = arith.constant 0 : index
      %205 = vector.load %arg6[%c0_53, %c0_54] : memref<8x32xf32, #tpu.memory_space<vmem>>, vector<8x32xf32>
      tpu.vector_store %arg6[%c0_53, %c0_54], %192 {strides = array<i32>} : memref<8x32xf32, #tpu.memory_space<vmem>>, vector<8x32xf32>,
    } else {
    }
    return
  }
  func.func @transform_0(%arg0: i32) -> (i32, i32, i32) {
    %c0_i32 = arith.constant 0 : i32
    %c0_i32_0 = arith.constant 0 : i32
    %c0_i32_1 = arith.constant 0 : i32
    return %arg0, %c0_i32, %c0_i32_0 : i32, i32, i32
  }
  func.func @transform_1(%arg0: i32) -> (i32, i32) {
    %c0_i32 = arith.constant 0 : i32
    %c0_i32_0 = arith.constant 0 : i32
    %c0_i32_1 = arith.constant 0 : i32
    return %c0_i32, %c0_i32_0 : i32, i32
  }
  func.func @transform_2(%arg0: i32) -> (i32, i32) {
    %c0_i32 = arith.constant 0 : i32
    %c0_i32_0 = arith.constant 0 : i32
    %c0_i32_1 = arith.constant 0 : i32
    return %c0_i32, %c0_i32_0 : i32, i32
  }
  func.func @transform_3(%arg0: i32) -> (i32, i32) {
    %c0_i32 = arith.constant 0 : i32
    %c0_i32_0 = arith.constant 0 : i32
    %c0_i32_1 = arith.constant 0 : i32
    return %c0_i32, %c0_i32_0 : i32, i32
  }
  func.func @transform_4(%arg0: i32) -> (i32, i32, i32) {
    %c0_i32 = arith.constant 0 : i32
    %c0_i32_0 = arith.constant 0 : i32
    %c0_i32_1 = arith.constant 0 : i32
    return %arg0, %c0_i32, %c0_i32_0 : i32, i32, i32
  }
  func.func @transform_5(%arg0: i32) -> (i32, i32) {
    %c0_i32 = arith.constant 0 : i32
    %c0_i32_0 = arith.constant 0 : i32
    %c0_i32_1 = arith.constant 0 : i32
    return %c0_i32, %c0_i32_0 : i32, i32
  }
}

</mosaic_0001>

<bundles_post_ra>
// kernel: encoder_rnn_forward.1
= control target key start
LH: loop header
LB: loop body
LE: loop exit
PB: predicated region body
PF: predicated region fallthrough
CT: control target
= control target key end

     0   :  { %v1200_v3 = vmov 0.0|0.0   ;;  %vm1201_vm0 = vmmov 0   ;;  %v1202_v6 = vmov 0.0   ;;  %vm25_vm1 = vcmask 261120   ;;  %s1427_s0 = inlined_call_operand.vmem [shape: f32[8,8,128], index: 0, kind: input, shape index: {}]   ;;  %s1428_s1 = inlined_call_operand.vmem [shape: f32[32,128], index: 1, kind: input, shape index: {}]   ;;  %s1429_s2 = inlined_call_operand.vmem [shape: f32[8,32], index: 2, kind: input, shape index: {}]   ;;  %s1430_s3 = inlined_call_operand.vmem [shape: f32[8,32], index: 3, kind: input, shape index: {}]   ;;  %s1431_s4 = inlined_call_operand.vmem [shape: f32[2,8,128], index: 4, kind: output, shape index: {0}]   ;;  %s1432_s5 = inlined_call_operand.hbm [shape: f32[8,32], index: 5, kind: output, shape index: {1}]  }
   0x1   :  { %v29_v0 = vld [vmem:[%s1428_s1] sm:$0xff]  ;;  %v30_v1 = vld [vmem:[%s1428_s1 + $0x8] sm:$0xff]  ;;  %v31_v2 = vld [vmem:[%s1428_s1 + $0x10] sm:$0xff]  ;;  %1073 = vmatprep.subr.bf16.mxu0 %v1200_v3  ;;  %993 = vmatprep.mubr.msk.f32.mxu0 %vm1201_vm0, %v1202_v6 }
   0x2   :  { %v1247_v4 = vpack.c.bf16 %v30_v1, %v29_v0  ;;  %v32_v5 = vld [vmem:[%s1428_s1 + $0x18] sm:$0xff]  ;;  %v24_v7 = vld [vmem:[%s1429_s2] sm:$0xff]  ;;  %1079 = vmatprep.subr.bf16.mxu1 %v1200_v3  ;;  %1004 = vmatprep.mubr.msk.f32.mxu1 %vm1201_vm0, %v1202_v6 }
   0x3   :  { %26 = vst.msk [vmem:[#allocation2] sm:$0xff] %vm25_vm1, %v24_v7 }
   0x4   :  { %11 = vsyncpa [#allocation5], 0  ;;  %1075 = vmatpush3.bf16.msra.mxu0 %v1247_v4  ;;  %v1262_v8 = vpack.c.bf16 %v32_v5, %v31_v2  ;;  %1081 = vmatpush3.bf16.msra.mxu1 %v1247_v4  ;;  %v27_v10 = vld [vmem:[%s1430_s3] sm:$0xff]  ;;  %s1203_s30 = smov 64   ;;  %s1204_s3 = smov 32   ;;  %v38_v32 = vld [vmem:[%s1427_s0 + $0x8] sm:$0xff] }
   0x5   :  { %1076 = vmatprep.subr.bf16.mxu0 %v1200_v3  ;;  %1082 = vmatprep.subr.bf16.mxu1 %v1200_v3  ;;  %28 = vst.msk [vmem:[#allocation3] sm:$0xff] %vm25_vm1, %v27_v10  ;;  %v37_v11 = vld [vmem:[%s1427_s0] sm:$0xff]  ;;  %v39_v51 = vld [vmem:[%s1427_s0 + $0x10] sm:$0xff]  ;;  %v40_v10 = vld [vmem:[%s1427_s0 + $0x18] sm:$0xff]  ;;  %vm456_vm2 = vcmask 523264   ;;  %vm458_vm3 = vcmask 785408  }
   0x6   :  { %s1206_s22 = smov [#allocation4]  }
   0x7   :  { %s905_s23 = sshll.u32 %s1206_s22, 4  ;;  %s906_s23 = int_to_ptr.vmem [resolvable:$true] %s905_s23 }
   0x8   :  { %1078 = vmatpush3.bf16.msra.mxu0 %v1262_v8  ;;  %1084 = vmatpush3.bf16.msra.mxu1 %v1262_v8  ;;  %s1176_s24 = scalar_lea.vmem %s906_s23, 128  ;;  %p1181_p1 = scmp.lt.s32.totalorder %s906_s23, %s906_s23 }
   0x9   :  { %1085 = vmatprep.subr.bf16.mxu0 %v1200_v3  ;;  %1091 = vmatprep.subr.bf16.mxu1 %v1200_v3  ;;  %p1177_p0 = scmp.ne.s32.totalorder %s906_s23, %s1176_s24  ;;  %p1182_p2 = scmp.lt.s32.totalorder %s1176_s24, %s1176_s24 }
   0xa   :  { %v33_v9 = vld [vmem:[#allocation2] sm:$0xff] }
   0xb   :  { %994 = vmatmul.mubr.msk.f32.vlgmr.msra.gmra.mrb[0].mxu0 %vm25_vm1, %v33_v9  ;;  %p1183_p3 = por %p1182_p2, %p1181_p1 }
   0xc   :  { %1087 = vmatpush3.bf16.msra.mxu0 %v1247_v4  ;;  %1015 = vmatprep.mubr.msk.f32.mxu0 %vm1201_vm0, %v1202_v6  ;;  %v34_v21 = vld [vmem:[#allocation3] sm:$0xff] }
   0xd   :  { %1088 = vmatprep.subr.bf16.mxu0 %v1200_v3  ;;  %p1184_p4 = pnand %p1183_p3, %p1177_p0 }
  0x10   :  { %1090 = vmatpush3.bf16.msra.mxu0 %v1262_v8 }
  0x11   :  { %1097 = vmatprep.subr.bf16.mxu0 %v1200_v3 }
  0xde   :  { %v111_v12 = vpop.f32.mrb[0].mxu0 }
  0xdf   :  { %v115_v13 = vadd.f32 %v111_v12, %v37_v11  ;;  %v995_v14 = vpop.f32.mrb[1].mxu0 }
  0xe1   :  { %v917_v15 = vmul.f32 -1.442695, %v115_v13 }
  0xe3   :  { %1128 = vpow2.f32 %v917_v15 }
  0xed   :  { %v1129_v16 = vpop.eup %1128 }
  0xee   :  { %v119_v17 = vadd.f32 1.0, %v1129_v16 }
  0xf0   :  { %1130 = vrcp.f32 %v119_v17 }
  0xfa   :  { %v1131_v18 = vpop.eup %1130 }
  0xfb   :  { %v122_v19 = vmul.f32 2.0, %v1131_v18 }
  0xfd   :  { %v918_v20 = vadd.f32 -1.0, %v122_v19 }
  0xff   :  { %130 = vrot.lane.b32.xlu0 %v918_v20, %s1203_s30 }
 0x103   :  { %125 = vrot.lane.b32.xlu0 %v34_v21, %s1204_s3 }
 0x171   :  { %v131_v22 = vpop.permute.xlu0 %130 }
 0x172   :  { %v133_v23 = vmul.f32 %v1131_v18, %v131_v22 }
 0x174   :  { %135 = vrot.lane.b32.xlu1 %v133_v23, %s1204_s3 }
 0x175   :  { %v126_v24 = vpop.permute.xlu0 %125 }
 0x176   :  { %v128_v25 = vmul.f32 %v1131_v18, %v126_v24 }
 0x1e6   :  { %v136_v26 = vpop.permute.xlu1 %135 }
 0x1e7   :  { %v138_v27 = vadd.f32 %v136_v26, %v128_v25 }
 0x1e9   :  { %1132 = vtanh.f32 %v138_v27 }
 0x1f3   :  { %v1133_v28 = vpop.eup %1132 }
 0x1f4   :  { %141 = vrot.lane.b32.xlu1 %v1133_v28, %s1203_s30 }
 0x266   :  { %v142_v29 = vpop.permute.xlu1 %141 }
 0x267   :  { %v144_v30 = vmul.f32 %v1131_v18, %v142_v29  ;;  %v928_v29 = vld [vmem:[%s1427_s0 + $0x20] sm:$0xff] }
 0x269   :  { %146 = vrot.lane.b32.xlu0 %v144_v30, %s1204_s3 }
 0x2db   :  { %v1290_v31 = vpop.permute.xlu0 %146 }
 0x2dc   :  { %1005 = vmatmul.mubr.msk.f32.vlgmr.msra.gmra.mrb[0].mxu1 %vm25_vm1, %v1290_v31 }
 0x2dd   :  { %1093 = vmatpush3.bf16.msra.mxu1 %v1247_v4  ;;  %1026 = vmatprep.mubr.msk.f32.mxu1 %vm1201_vm0, %v1202_v6 }
 0x2de   :  { %1094 = vmatprep.subr.bf16.mxu1 %v1200_v3 }
 0x2e1   :  { %1096 = vmatpush3.bf16.msra.mxu1 %v1262_v8 }
 0x2e2   :  { %1103 = vmatprep.subr.bf16.mxu1 %v1200_v3 }
 0x3af   :  { %v216_v33 = vpop.f32.mrb[0].mxu1 }
 0x3b0   :  { %v220_v34 = vadd.f32 %v216_v33, %v38_v32  ;;  %v1006_v35 = vpop.f32.mrb[1].mxu1 }
 0x3b2   :  { %v920_v36 = vmul.f32 -1.442695, %v220_v34 }
 0x3b4   :  { %1134 = vpow2.f32 %v920_v36 }
 0x3be   :  { %v1135_v37 = vpop.eup %1134 }
 0x3bf   :  { %v224_v38 = vadd.f32 1.0, %v1135_v37 }
 0x3c1   :  { %1136 = vrcp.f32 %v224_v38 }
 0x3cb   :  { %v1137_v39 = vpop.eup %1136 }
 0x3cc   :  { %v227_v40 = vmul.f32 2.0, %v1137_v39  ;;  %v229_v44 = vmul.f32 %v1137_v39, %v138_v27 }
 0x3ce   :  { %v921_v41 = vadd.f32 -1.0, %v227_v40 }
 0x3d0   :  { %231 = vrot.lane.b32.xlu1 %v921_v41, %s1203_s30 }
 0x442   :  { %v232_v42 = vpop.permute.xlu1 %231 }
 0x443   :  { %v234_v43 = vmul.f32 %v1137_v39, %v232_v42 }
 0x445   :  { %236 = vrot.lane.b32.xlu0 %v234_v43, %s1204_s3 }
 0x4b7   :  { %v237_v45 = vpop.permute.xlu0 %236 }
 0x4b8   :  { %v239_v46 = vadd.f32 %v237_v45, %v229_v44 }
 0x4ba   :  { %1138 = vtanh.f32 %v239_v46 }
 0x4c4   :  { %v1139_v47 = vpop.eup %1138 }
 0x4c5   :  { %242 = vrot.lane.b32.xlu1 %v1139_v47, %s1203_s30 }
 0x537   :  { %v243_v48 = vpop.permute.xlu1 %242 }
 0x538   :  { %v1306_v49 = vmul.f32 %v1137_v39, %v243_v48 }
 0x53a   :  { %247 = vrot.lane.b32.xlu0 %v1306_v49, %s1204_s3 }
 0x5ac   :  { %v248_v50 = vpop.permute.xlu0 %247 }
 0x5ad   :  { %1016 = vmatmul.mubr.msk.f32.vlgmr.msra.gmra.mrb[2].mxu0 %vm25_vm1, %v248_v50  ;;  %v929_v50 = vld [vmem:[%s1427_s0 + $0x28] sm:$0xff] }
 0x5ae   :  { %1099 = vmatpush3.bf16.msra.mxu0 %v1247_v4  ;;  %1037 = vmatprep.mubr.msk.f32.mxu0 %vm1201_vm0, %v1202_v6 }
 0x5af   :  { %1100 = vmatprep.subr.bf16.mxu0 %v1200_v3 }
 0x5b2   :  { %1102 = vmatpush3.bf16.msra.mxu0 %v1262_v8 }
 0x5b3   :  { %1109 = vmatprep.subr.bf16.mxu0 %v1200_v3 }
 0x680   :  { %v317_v52 = vpop.f32.mrb[2].mxu0 }
 0x681   :  { %v321_v53 = vadd.f32 %v317_v52, %v39_v51  ;;  %v1017_v54 = vpop.f32.mrb[3].mxu0 }
 0x683   :  { %v923_v55 = vmul.f32 -1.442695, %v321_v53 }
 0x685   :  { %1140 = vpow2.f32 %v923_v55 }
 0x68f   :  { %v1141_v56 = vpop.eup %1140 }
 0x690   :  { %v325_v57 = vadd.f32 1.0, %v1141_v56 }
 0x692   :  { %1142 = vrcp.f32 %v325_v57 }
 0x69c   :  { %v1143_v58 = vpop.eup %1142 }
 0x69d   :  { %v328_v59 = vmul.f32 2.0, %v1143_v58  ;;  %v330_v63 = vmul.f32 %v1143_v58, %v239_v46 }
 0x69f   :  { %v924_v60 = vadd.f32 -1.0, %v328_v59 }
 0x6a1   :  { %332 = vrot.lane.b32.xlu1 %v924_v60, %s1203_s30 }
 0x713   :  { %v333_v61 = vpop.permute.xlu1 %332 }
 0x714   :  { %v335_v62 = vmul.f32 %v1143_v58, %v333_v61 }
 0x716   :  { %337 = vrot.lane.b32.xlu0 %v335_v62, %s1204_s3 }
 0x788   :  { %v338_v0 = vpop.permute.xlu0 %337 }
 0x789   :  { %v340_v1 = vadd.f32 %v338_v0, %v330_v63 }
 0x78b   :  { %1144 = vtanh.f32 %v340_v1 }
 0x795   :  { %v1145_v2 = vpop.eup %1144 }
 0x796   :  { %343 = vrot.lane.b32.xlu1 %v1145_v2, %s1203_s30 }
 0x808   :  { %v344_v5 = vpop.permute.xlu1 %343 }
 0x809   :  { %v1323_v7 = vmul.f32 %v1143_v58, %v344_v5 }
 0x80b   :  { %348 = vrot.lane.b32.xlu0 %v1323_v7, %s1204_s3 }
 0x87d   :  { %v349_v9 = vpop.permute.xlu0 %348 }
 0x87e   :  { %1027 = vmatmul.mubr.msk.f32.vlgmr.msra.gmra.mrb[2].mxu1 %vm25_vm1, %v349_v9 }
 0x87f   :  { %1105 = vmatpush3.bf16.msra.mxu1 %v1247_v4  ;;  %1048 = vmatprep.mubr.msk.f32.mxu1 %vm1201_vm0, %v1202_v6 }
 0x880   :  { %1106 = vmatprep.subr.bf16.mxu1 %v1200_v3 }
 0x883   :  { %1108 = vmatpush3.bf16.msra.mxu1 %v1262_v8 }
 0x884   :  { %1115 = vmatprep.subr.bf16.mxu1 %v1200_v3 }
 0x951   :  { %v418_v11 = vpop.f32.mrb[2].mxu1 }
 0x952   :  { %v422_v12 = vadd.f32 %v418_v11, %v40_v10  ;;  %v1028_v13 = vpop.f32.mrb[3].mxu1 }
 0x954   :  { %v926_v14 = vmul.f32 -1.442695, %v422_v12 }
 0x956   :  { %1146 = vpow2.f32 %v926_v14 }
 0x960   :  { %v1147_v15 = vpop.eup %1146 }
 0x961   :  { %v426_v16 = vadd.f32 1.0, %v1147_v15 }
 0x963   :  { %1148 = vrcp.f32 %v426_v16 }
 0x96d   :  { %v1149_v17 = vpop.eup %1148 }
 0x96e   :  { %v429_v18 = vmul.f32 2.0, %v1149_v17  ;;  %v431_v22 = vmul.f32 %v1149_v17, %v340_v1  ;;  %v930_v1 = vld [vmem:[%s1427_s0 + $0x30] sm:$0xff] }
 0x970   :  { %v927_v19 = vadd.f32 -1.0, %v429_v18 }
 0x972   :  { %433 = vrot.lane.b32.xlu1 %v927_v19, %s1203_s30 }
 0x9e4   :  { %v434_v20 = vpop.permute.xlu1 %433 }
 0x9e5   :  { %v436_v21 = vmul.f32 %v1149_v17, %v434_v20 }
 0x9e7   :  { %438 = vrot.lane.b32.xlu0 %v436_v21, %s1204_s3 }
 0xa59   :  { %v439_v23 = vpop.permute.xlu0 %438 }
 0xa5a   :  { %v441_v24 = vadd.f32 %v439_v23, %v431_v22 }
 0xa5c   :  { %1150 = vtanh.f32 %v441_v24 }
 0xa66   :  { %v1151_v25 = vpop.eup %1150 }
 0xa67   :  { %444 = vrot.lane.b32.xlu1 %v1151_v25, %s1203_s30  ;;  %v931_v25 = vld [vmem:[%s1427_s0 + $0x38] sm:$0xff]  ;;  %s1205_s0 = smov 96  }
 0xad9   :  { %v445_v26 = vpop.permute.xlu1 %444 }
 0xada   :  { %v1340_v27 = vmul.f32 %v1149_v17, %v445_v26 }
 0xadc   :  { %468 = vrot.lane.b32.xlu0 %v1340_v27, %s1204_s3 }
 0xb4e   :  { %v469_v28 = vpop.permute.xlu0 %468 }
 0xb4f   :  { %1038 = vmatmul.mubr.msk.f32.vlgmr.msra.gmra.mrb[4].mxu0 %vm25_vm1, %v469_v28 }
 0xb50   :  { %1111 = vmatpush3.bf16.msra.mxu0 %v1247_v4  ;;  %1059 = vmatprep.mubr.msk.f32.mxu0 %vm1201_vm0, %v1202_v6 }
 0xb51   :  { %1112 = vmatprep.subr.bf16.mxu0 %v1200_v3 }
 0xb54   :  { %1114 = vmatpush3.bf16.msra.mxu0 %v1262_v8 }
 0xc22   :  { %v538_v30 = vpop.f32.mrb[4].mxu0 }
 0xc23   :  { %v542_v32 = vadd.f32 %v928_v29, %v538_v30  ;;  %v1039_v33 = vpop.f32.mrb[5].mxu0 }
 0xc25   :  { %v933_v34 = vmul.f32 -1.442695, %v542_v32 }
 0xc27   :  { %1152 = vpow2.f32 %v933_v34 }
 0xc31   :  { %v1153_v35 = vpop.eup %1152 }
 0xc32   :  { %v546_v36 = vadd.f32 1.0, %v1153_v35 }
 0xc34   :  { %1154 = vrcp.f32 %v546_v36 }
 0xc3e   :  { %v1155_v37 = vpop.eup %1154 }
 0xc3f   :  { %v549_v38 = vmul.f32 2.0, %v1155_v37  ;;  %v551_v42 = vmul.f32 %v1155_v37, %v441_v24 }
 0xc41   :  { %v934_v39 = vadd.f32 -1.0, %v549_v38 }
 0xc43   :  { %553 = vrot.lane.b32.xlu1 %v934_v39, %s1203_s30 }
 0xcb5   :  { %v554_v40 = vpop.permute.xlu1 %553 }
 0xcb6   :  { %v556_v41 = vmul.f32 %v1155_v37, %v554_v40 }
 0xcb8   :  { %558 = vrot.lane.b32.xlu0 %v556_v41, %s1204_s3 }
 0xd2a   :  { %v559_v43 = vpop.permute.xlu0 %558 }
 0xd2b   :  { %v561_v44 = vadd.f32 %v559_v43, %v551_v42 }
 0xd2d   :  { %1156 = vtanh.f32 %v561_v44 }
 0xd37   :  { %v1157_v45 = vpop.eup %1156 }
 0xd38   :  { %564 = vrot.lane.b32.xlu1 %v1157_v45, %s1203_s30 }
 0xdaa   :  { %v565_v46 = vpop.permute.xlu1 %564 }
 0xdab   :  { %v567_v47 = vmul.f32 %v1155_v37, %v565_v46 }
 0xdad   :  { %569 = vrot.lane.b32.xlu0 %v567_v47, %s1204_s3 }
 0xe1f   :  { %v1357_v48 = vpop.permute.xlu0 %569 }
 0xe20   :  { %1049 = vmatmul.mubr.msk.f32.vlgmr.msra.gmra.mrb[4].mxu1 %vm25_vm1, %v1357_v48 }
 0xe21   :  { %1117 = vmatpush3.bf16.msra.mxu1 %v1247_v4  ;;  %1070 = vmatprep.mubr.msk.f32.mxu1 %vm1201_vm0, %v1202_v6 }
 0xe22   :  { %1118 = vmatprep.subr.bf16.mxu1 %v1200_v3 }
 0xe25   :  { %1120 = vmatpush3.bf16.msra.mxu1 %v1262_v8 }
 0xef3   :  { %v639_v51 = vpop.f32.mrb[4].mxu1 }
 0xef4   :  { %v643_v52 = vadd.f32 %v929_v50, %v639_v51  ;;  %v1050_v53 = vpop.f32.mrb[5].mxu1 }
 0xef6   :  { %v936_v54 = vmul.f32 -1.442695, %v643_v52 }
 0xef8   :  { %1158 = vpow2.f32 %v936_v54 }
 0xf02   :  { %v1159_v55 = vpop.eup %1158 }
 0xf03   :  { %v647_v56 = vadd.f32 1.0, %v1159_v55 }
 0xf05   :  { %1160 = vrcp.f32 %v647_v56 }
 0xf0f   :  { %v1161_v4 = vpop.eup %1160 }
 0xf10   :  { %v650_v57 = vmul.f32 2.0, %v1161_v4  ;;  %v652_v8 = vmul.f32 %v1161_v4, %v561_v44 }
 0xf12   :  { %v937_v58 = vadd.f32 -1.0, %v650_v57 }
 0xf14   :  { %654 = vrot.lane.b32.xlu1 %v937_v58, %s1203_s30 }
 0xf86   :  { %v655_v3 = vpop.permute.xlu1 %654 }
 0xf87   :  { %v657_v6 = vmul.f32 %v1161_v4, %v655_v3 }
 0xf89   :  { %659 = vrot.lane.b32.xlu0 %v657_v6, %s1204_s3 }
 0xffb   :  { %v660_v59 = vpop.permute.xlu0 %659 }
 0xffc   :  { %v662_v60 = vadd.f32 %v660_v59, %v652_v8 }
 0xffe   :  { %1162 = vtanh.f32 %v662_v60 }
0x1008   :  { %v1163_v61 = vpop.eup %1162 }
0x1009   :  { %665 = vrot.lane.b32.xlu1 %v1163_v61, %s1203_s30 }
0x107b   :  { %v666_v62 = vpop.permute.xlu1 %665 }
0x107c   :  { %v1372_v63 = vmul.f32 %v1161_v4, %v666_v62 }
0x107e   :  { %670 = vrot.lane.b32.xlu0 %v1372_v63, %s1204_s3 }
0x10f0   :  { %v671_v0 = vpop.permute.xlu0 %670 }
0x10f1   :  { %1060 = vmatmul.mubr.msk.f32.vlgmr.msra.gmra.mrb[6].mxu0 %vm25_vm1, %v671_v0 }
0x11c4   :  { %v740_v2 = vpop.f32.mrb[6].mxu0 }
0x11c5   :  { %v744_v5 = vadd.f32 %v930_v1, %v740_v2  ;;  %v1061_v9 = vpop.f32.mrb[7].mxu0 }
0x11c7   :  { %v939_v10 = vmul.f32 -1.442695, %v744_v5 }
0x11c9   :  { %1164 = vpow2.f32 %v939_v10 }
0x11d3   :  { %v1165_v11 = vpop.eup %1164 }
0x11d4   :  { %v748_v12 = vadd.f32 1.0, %v1165_v11 }
0x11d6   :  { %1166 = vrcp.f32 %v748_v12 }
0x11e0   :  { %v1167_v13 = vpop.eup %1166 }
0x11e1   :  { %v751_v14 = vmul.f32 2.0, %v1167_v13  ;;  %v753_v18 = vmul.f32 %v1167_v13, %v662_v60 }
0x11e3   :  { %v940_v15 = vadd.f32 -1.0, %v751_v14 }
0x11e5   :  { %755 = vrot.lane.b32.xlu1 %v940_v15, %s1203_s30 }
0x1257   :  { %v756_v16 = vpop.permute.xlu1 %755 }
0x1258   :  { %v758_v17 = vmul.f32 %v1167_v13, %v756_v16 }
0x125a   :  { %760 = vrot.lane.b32.xlu0 %v758_v17, %s1204_s3 }
0x12cc   :  { %v761_v19 = vpop.permute.xlu0 %760 }
0x12cd   :  { %v763_v20 = vadd.f32 %v761_v19, %v753_v18 }
0x12cf   :  { %1168 = vtanh.f32 %v763_v20 }
0x12d9   :  { %v1169_v21 = vpop.eup %1168 }
0x12da   :  { %766 = vrot.lane.b32.xlu1 %v1169_v21, %s1203_s30 }
0x134c   :  { %v767_v22 = vpop.permute.xlu1 %766 }
0x134d   :  { %v769_v23 = vmul.f32 %v1167_v13, %v767_v22 }
0x134f   :  { %771 = vrot.lane.b32.xlu0 %v769_v23, %s1204_s3 }
0x13c1   :  { %v772_v24 = vpop.permute.xlu0 %771 }
0x13c2   :  { %1071 = vmatmul.mubr.msk.f32.vlgmr.msra.gmra.mrb[6].mxu1 %vm25_vm1, %v772_v24 }
0x1495   :  { %v841_v26 = vpop.f32.mrb[6].mxu1 }
0x1496   :  { %v845_v28 = vadd.f32 %v931_v25, %v841_v26  ;;  %v1072_v29 = vpop.f32.mrb[7].mxu1 }
0x1498   :  { %v942_v30 = vmul.f32 -1.442695, %v845_v28 }
0x149a   :  { %1170 = vpow2.f32 %v942_v30 }
0x14a4   :  { %v1171_v32 = vpop.eup %1170 }
0x14a5   :  { %v849_v33 = vadd.f32 1.0, %v1171_v32 }
0x14a7   :  { %1172 = vrcp.f32 %v849_v33 }
0x14b1   :  { %v1173_v34 = vpop.eup %1172 }
0x14b2   :  { %v852_v35 = vmul.f32 2.0, %v1173_v34  ;;  %v854_v39 = vmul.f32 %v1173_v34, %v763_v20 }
0x14b4   :  { %v943_v36 = vadd.f32 -1.0, %v852_v35 }
0x14b6   :  { %856 = vrot.lane.b32.xlu1 %v943_v36, %s1203_s30 }
0x1528   :  { %v857_v37 = vpop.permute.xlu1 %856 }
0x1529   :  { %v859_v38 = vmul.f32 %v1173_v34, %v857_v37 }
0x152b   :  { %861 = vrot.lane.b32.xlu0 %v859_v38, %s1204_s3 }
0x152f   :  { %449 = vrot.lane.b32.xlu0 %v1306_v49, %s1203_s30 }
0x1533   :  { %452 = vrot.lane.b32.xlu0 %v1323_v7, %s1205_s0 }
0x159d   :  { %v862_v40 = vpop.permute.xlu0 %861 }
0x159e   :  { %v864_v41 = vadd.f32 %v862_v40, %v854_v39 }
0x15a0   :  { %1174 = vtanh.f32 %v864_v41  ;;  %889 = vrot.lane.b32.xlu0 %v864_v41, %s1205_s0 }
0x15a1   :  { %v450_v42 = vpop.permute.xlu0 %449 }
0x15a2   :  { %v455_v43 = vsel %vm25_vm1, %v1290_v31, %v450_v42 }
0x15a5   :  { %v453_v44 = vpop.permute.xlu0 %452 }
0x15a6   :  { %v457_v45 = vsel %vm456_vm2, %v455_v43, %v453_v44 }
0x15a7   :  { %v459_v49 = vsel %vm458_vm3, %v457_v45, %v1340_v27 }
0x15a8   :  { %460 = vst [vmem:[%s1431_s4] sm:$0xff] %v459_v49 }
0x15aa   :  { %v1175_v7 = vpop.eup %1174 }
0x15ab   :  { %867 = vrot.lane.b32.xlu1 %v1175_v7, %s1203_s30 }
0x15af   :  { %872 = vrot.lane.b32.xlu1 %v1372_v63, %s1203_s30 }
0x15b3   :  { %875 = vrot.lane.b32.xlu1 %v769_v23, %s1205_s0 }
0x1612   :  { %v890_v31 = vpop.permute.xlu0 %889 }
0x1613   :  { %892 = vst.msk [vmem:[#allocation3] sm:$0xff] %vm25_vm1, %v890_v31  ;;  %896 = vst.msk [vmem:[#allocation4] sm:$0xff] %vm25_vm1, %v890_v31 }
0x1614   :  { %1187 = shalt.err (!%p1184_p4)
}
0x1615   :  { %s1188_s27 = scalar_lea.hbm %s1432_s5, 128 }
0x1616   :  { %p1189_p5 = scmp.ne.s32.totalorder %s1432_s5, %s1188_s27  ;;  %p1192_p6 = scmp.lt.u32.totalorder %s1188_s27, %s1432_s5 }
0x1618   :  { %p1194_p7 = pnand %p1192_p6, %p1189_p5 }
0x161a   :  { %1197 = shalt.err (!%p1194_p7)
}
0x161b   :  { %908 = dma.vmem_to_hbm [thread:$0]  %s906_s23, 128, %s1432_s5, [#allocation5]  }
0x161d   :  { %v868_v27 = vpop.permute.xlu1 %867 }
0x161e   :  { %v870_v46 = vmul.f32 %v1173_v34, %v868_v27 }
0x1620   :  { %884 = vrot.lane.b32.xlu1 %v870_v46, %s1204_s3 }
0x1621   :  { %v873_v47 = vpop.permute.xlu1 %872 }
0x1622   :  { %v878_v50 = vsel %vm25_vm1, %v1357_v48, %v873_v47 }
0x1625   :  { %v876_v51 = vpop.permute.xlu1 %875 }
0x1626   :  { %v879_v52 = vsel %vm456_vm2, %v878_v50, %v876_v51 }
0x1627   :  { %v880_v53 = vsel %vm458_vm3, %v879_v52, %v870_v46 }
0x1628   :  { %944 = vst [vmem:[%s1431_s4 + $0x8] sm:$0xff] %v880_v53 }
0x1692   :  { %v885_v54 = vpop.permute.xlu1 %884 }
0x1693   :  { %887 = vst.msk [vmem:[#allocation2] sm:$0xff] %vm25_vm1, %v885_v54 }
0x1694   :  { %1198 = dma.done.wait [#allocation5], 128  }
0x1695   :  { %1199 = vsyncadd [#allocation5], 4294967168 }
0x1696   :  { %914 = vsyncpa [#allocation5], 1 }

</bundles_post_ra>
